<compile_context>
chip_gen: v5e
topology: v5e:2x2
jax: 0.10.0
libtpu: 0.0.40
codegen_flags: <defaults>
</compile_context>

<pallas_src>
import functools

import jax
import jax.numpy as jnp
from jax.experimental import pallas as pl
from jax.experimental.pallas import tpu as pltpu


def _cdiv(a, b):
    return -(-a // b)


def _round_up(a, b):
    return _cdiv(a, b) * b


# --------------------------------------------------------------------------
# Kernels
# --------------------------------------------------------------------------
def _leaky_relu(y, negative_slope):
    if 0.0 <= negative_slope <= 1.0:
        # max(y, a*y) == leaky_relu(y) for 0 <= a <= 1; single VPU max.
        return jnp.maximum(y, negative_slope * y)
    return jnp.where(y >= 0, y, negative_slope * y)


def _fc_elementwise_kernel(x_ref, w_ref, o_ref, *, negative_slope):
    y = x_ref[...] * w_ref[...]                    # (tb, td) * (1, td)
    o_ref[...] = _leaky_relu(y, negative_slope).astype(o_ref.dtype)


def _fc_elementwise_bias_kernel(x_ref, w_ref, b_ref, o_ref, *, negative_slope):
    y = x_ref[...] * w_ref[...] + b_ref[...]       # (tb, td) * (1, td) + (1, td)
    o_ref[...] = _leaky_relu(y, negative_slope).astype(o_ref.dtype)


# --------------------------------------------------------------------------
# Tile-size selection (bandwidth-oriented, VMEM-budgeted)
# --------------------------------------------------------------------------
def _choose_blocks(B, D, itemsize, vmem_budget_bytes, buffer_count):
    # Sublane packing: 8 rows for 32-bit, 16 for bf16/f16, 32 for int8/fp8.
    sublane = max(8, 32 // max(1, itemsize))

    # Feature (lane) blocking: block whenever D is large, regardless of
    # 128-alignment (ragged last block is padded/masked by Pallas).  This
    # keeps the per-row footprint bounded so unaligned huge D can't OOM VMEM.
    block_d = 2048 if D > 2048 else D

    # Batch blocking: biggest row tile such that the pipelined x + out tiles
    # (each buffer_count deep) fit the budget.  No arbitrary row cap.
    per_row_bytes = 2 * buffer_count * block_d * itemsize
    max_rows = max(1, vmem_budget_bytes // per_row_bytes)
    block_b = min(B, max_rows)

    # Guarantee >= 2 batch blocks when B is big enough, so both v7x
    # TensorCores get work under "parallel" semantics.
    if block_b >= B and B >= 2 * sublane:
        block_b = _round_up(_cdiv(B, 2), sublane)

    if block_b < B:
        block_b = max(sublane, (block_b // sublane) * sublane)
        # Prefer an even number of batch blocks (avoids one idle v7x core on
        # the tail step) — only if the smaller tile still fits the budget.
        nb = _cdiv(B, block_b)
        if nb > 1 and nb % 2 == 1:
            cand = _round_up(_cdiv(B, nb + 1), sublane)
            if sublane <= cand <= block_b and _cdiv(B, cand) % 2 == 0:
                block_b = cand
    if block_b >= B:
        block_b = B
    return block_b, block_d


# --------------------------------------------------------------------------
# pallas_call builder
# --------------------------------------------------------------------------
def _fc_elementwise_2d(x, weight, bias, *, negative_slope, block_b, block_d,
                       vmem_budget_bytes, buffer_count):
    B, D = x.shape
    itemsize = jnp.dtype(x.dtype).itemsize

    auto_b, auto_d = _choose_blocks(B, D, itemsize, vmem_budget_bytes,
                                    buffer_count)
    block_b = auto_b if block_b is None else min(block_b, B)
    block_d = auto_d if block_d is None else min(block_d, D)

    # Feature axis outer, batch axis inner: weight/bias block index stays
    # constant across the inner sweep (stays resident, no re-DMA).
    grid = (_cdiv(D, block_d), _cdiv(B, block_b))

    # Explicit scoped-VMEM limit: pipelined x+out tiles plus slack; at least
    # 32 MiB so a raised budget is reachable, at most 40 MiB so it always fits
    # v7x's 64 MiB per-TC VMEM (v5e/v6e have 128 MiB physical).
    tile_bytes = block_b * block_d * itemsize
    footprint = (2 * buffer_count * tile_bytes
                 + 4 * buffer_count * block_d * itemsize)   # + weight/bias rows
    vmem_limit = int(min(40 << 20, max(32 << 20, footprint + (4 << 20))))

    pipeline_mode = pl.Buffered(buffer_count) if buffer_count != 2 else None

    def _spec(shape, index_map):
        if pipeline_mode is None:
            return pl.BlockSpec(shape, index_map)
        return pl.BlockSpec(shape, index_map, pipeline_mode=pipeline_mode)

    x_spec = _spec((block_b, block_d), lambda j, i: (i, j))
    o_spec = _spec((block_b, block_d), lambda j, i: (i, j))
    w_spec = pl.BlockSpec((1, block_d), lambda j, i: (0, j))

    # Keep VPU math packed in x's dtype (bf16 VALU on v6e/v7x); output dtype
    # follows x.dtype (note: differs from PyTorch's f32 promotion for
    # mixed bf16-x / f32-weight callers).
    w2 = weight.reshape(1, D).astype(x.dtype)

    if bias is None:
        kernel = functools.partial(_fc_elementwise_kernel,
                                   negative_slope=negative_slope)
        in_specs = [x_spec, w_spec]
        args = (x, w2)
    else:
        kernel = functools.partial(_fc_elementwise_bias_kernel,
                                   negative_slope=negative_slope)
        in_specs = [x_spec, w_spec,
                    pl.BlockSpec((1, block_d), lambda j, i: (0, j))]
        args = (x, w2, bias.reshape(1, D).astype(x.dtype))

    return pl.pallas_call(
        kernel,
        out_shape=jax.ShapeDtypeStruct((B, D), x.dtype),
        grid=grid,
        in_specs=in_specs,
        out_specs=o_spec,
        compiler_params=pltpu.CompilerParams(
            dimension_semantics=("parallel", "parallel"),
            vmem_limit_bytes=vmem_limit,
        ),
    )(*args)


# --------------------------------------------------------------------------
# Wrapper
# --------------------------------------------------------------------------
def fc_elementwise(x, weight, bias=None, *, negative_slope=0.01,
                   block_b=None, block_d=None, vmem_budget_bytes=16 << 20,
                   buffer_count=2):
    """out = leaky_relu(x * weight [+ bias]); weight/bias shape (piSize,)."""
    B, D = x.shape
    assert weight.shape == (D,)
    if bias is not None:
        assert bias.shape == (D,)

    # Keep the total pipelined footprint v7x-safe even for huge user budgets.
    vmem_budget_bytes = min(int(vmem_budget_bytes), 36 << 20)

    # Lane-dense refold for tiny feature dims: view (B, D) as (B*D/128, 128)
    # and tile weight/bias so output stores are full-width (unmasked) vst.
    if (block_b is None and block_d is None and D < 128 and 128 % D == 0
            and B % (128 // D) == 0 and B >= (128 // D)):
        fold = 128 // D
        out = _fc_elementwise_2d(
            x.reshape(B // fold, D * fold),
            jnp.tile(weight, fold),
            None if bias is None else jnp.tile(bias, fold),
            negative_slope=negative_slope, block_b=None, block_d=None,
            vmem_budget_bytes=vmem_budget_bytes, buffer_count=buffer_count)
        return out.reshape(B, D)

    return _fc_elementwise_2d(
        x, weight, bias, negative_slope=negative_slope,
        block_b=block_b, block_d=block_d,
        vmem_budget_bytes=vmem_budget_bytes, buffer_count=buffer_count)


# --------------------------------------------------------------------------
# Self-test
# --------------------------------------------------------------------------
if __name__ == "__main__":
    key = jax.random.PRNGKey(0)
    keys = jax.random.split(key, 8)

    def ref_fn(x, w, b=None, slope=0.01):
        y = x.astype(jnp.float32) * w.astype(jnp.float32)[None, :]
        if b is not None:
            y = y + b.astype(jnp.float32)[None, :]
        return jnp.where(y >= 0, y, slope * y)

    input_dim = 128   # only used for Glorot init range in the module
    init_range = jnp.sqrt(6.0 / (input_dim + input_dim))

    # --- Case 1: module-default config (bias=False), small shape ------------
    B1, D1 = 8, 128
    x1 = jax.random.normal(keys[0], (B1, D1), dtype=jnp.float32)
    w1 = jax.random.uniform(keys[1], (D1,), dtype=jnp.float32,
                            minval=-init_range, maxval=init_range)
    out1 = jax.block_until_ready(fc_elementwise(x1, w1))
    assert out1.shape == (B1, D1)
    assert jnp.allclose(out1, ref_fn(x1, w1), atol=1e-6, rtol=1e-6)

    # --- Case 2: small feature dim -> lane-dense refold path, with bias -----
    B2, D2 = 64, 32
    x2 = jax.random.normal(keys[2], (B2, D2), dtype=jnp.float32)
    w2 = jax.random.uniform(keys[3], (D2,), dtype=jnp.float32,
                            minval=-init_range, maxval=init_range)
    b2 = jax.random.uniform(keys[4], (D2,), dtype=jnp.float32,
                            minval=-init_range, maxval=init_range)
    out2 = jax.block_until_ready(fc_elementwise(x2, w2, b2))
    assert out2.shape == (B2, D2)
    assert jnp.allclose(out2, ref_fn(x2, w2, b2), atol=1e-6, rtol=1e-6)

    # --- Case 3: bf16 input, multi-block batch grid + ragged last block -----
    B3, D3 = 48, 256
    x3 = jax.random.normal(keys[5], (B3, D3), dtype=jnp.float32).astype(jnp.bfloat16)
    w3 = jax.random.uniform(keys[6], (D3,), dtype=jnp.float32,
                            minval=-init_range, maxval=init_range)
    b3 = jax.random.uniform(keys[7], (D3,), dtype=jnp.float32,
                            minval=-init_range, maxval=init_range)
    out3 = jax.block_until_ready(fc_elementwise(x3, w3, b3))
    assert out3.shape == (B3, D3)
    assert jnp.allclose(out3.astype(jnp.float32), ref_fn(x3, w3, b3),
                        atol=2e-2, rtol=2e-2)

    print("KERNEL_OK")
</pallas_src>

<mosaic_0001>
module attributes {stable_mosaic.version = 11 : i64} {
  func.func @_fc_elementwise_kernel(%arg0: i32, %arg1: i32, %arg2: memref<8x128xf32, #tpu.memory_space<vmem>>, %arg3: memref<1x128xf32, #tpu.memory_space<vmem>>, %arg4: memref<8x128xf32, #tpu.memory_space<vmem>>) attributes {dimension_semantics = [#tpu.dimension_semantics<parallel>, #tpu.dimension_semantics<parallel>], iteration_bounds = array<i64: 1, 1>, scalar_prefetch = 0 : i64, scratch_operands = 0 : i64, tpu.core_type = #tpu.core_type<tc>, window_params = [{transform_indices = @transform_0, window_bounds = array<i64: 8, 128>}, {transform_indices = @transform_1, window_bounds = array<i64: 1, 128>}, {transform_indices = @transform_2, window_bounds = array<i64: 8, 128>}]} {
    %c0 = arith.constant 0 : index
    %c0_0 = arith.constant 0 : index
    %0 = vector.load %arg2[%c0, %c0_0] : memref<8x128xf32, #tpu.memory_space<vmem>>, vector<8x128xf32>
    %c0_1 = arith.constant 0 : index
    %c0_2 = arith.constant 0 : index
    %1 = vector.load %arg3[%c0_1, %c0_2] : memref<1x128xf32, #tpu.memory_space<vmem>>, vector<1x128xf32>
    %2 = vector.broadcast %1 : vector<1x128xf32> to vector<8x128xf32>
    %3 = arith.mulf %0, %2 : vector<8x128xf32>
    %cst = arith.constant 0.00999999977 : f32
    %4 = vector.broadcast %cst : f32 to vector<8x128xf32>
    %5 = arith.mulf %4, %3 : vector<8x128xf32>
    %6 = arith.maximumf %3, %5 : vector<8x128xf32>
    %c0_3 = arith.constant 0 : index
    %c0_4 = arith.constant 0 : index
    %7 = vector.load %arg4[%c0_3, %c0_4] : memref<8x128xf32, #tpu.memory_space<vmem>>, vector<8x128xf32>
    tpu.vector_store %arg4[%c0_3, %c0_4], %6 {strides = array<i32>} : memref<8x128xf32, #tpu.memory_space<vmem>>, vector<8x128xf32>,
    return
  }
  func.func @transform_0(%arg0: i32, %arg1: i32) -> (i32, i32) {
    %c0_i32 = arith.constant 0 : i32
    return %arg1, %arg0 : i32, i32
  }
  func.func @transform_1(%arg0: i32, %arg1: i32) -> (i32, i32) {
    %c0_i32 = arith.constant 0 : i32
    %c0_i32_0 = arith.constant 0 : i32
    return %c0_i32, %arg0 : i32, i32
  }
  func.func @transform_2(%arg0: i32, %arg1: i32) -> (i32, i32) {
    %c0_i32 = arith.constant 0 : i32
    return %arg1, %arg0 : i32, i32
  }
}

</mosaic_0001>

<bundles_post_ra>
// kernel: tpu_custom_call.1
= control target key start
LH: loop header
LB: loop body
LE: loop exit
PB: predicated region body
PF: predicated region fallthrough
CT: control target
= control target key end

     0   :  { %7 = vsyncpa [#allocation3], 0  ;;  %s176_s0 = inlined_call_operand.hbm [shape: f32[8,128], index: 0, kind: input, shape index: {}]   ;;  %s177_s1 = inlined_call_operand.hbm [shape: f32[1,128], index: 1, kind: input, shape index: {}]   ;;  %s178_s2 = inlined_call_operand.hbm [shape: f32[8,128], index: 2, kind: output, shape index: {}]  }
   0x1   :  { %8 = vsyncpa [#allocation6], 0 }
   0x2   :  { %9 = vsyncpa [#allocation4], 0  ;;  %s15_s11 = sshll.u32 %s176_s0, 4  ;;  %s149_s12 = smov [#allocation2]   ;;  %s16_s11 = int_to_ptr.hbm [resolvable:$true] %s15_s11 }
   0x3   :  { %s17_s13 = sshll.u32 %s149_s12, 4  ;;  %s26_s16 = sshll.u32 %s177_s1, 4  ;;  %s18_s13 = int_to_ptr.vmem [resolvable:$true] %s17_s13  ;;  %s27_s16 = int_to_ptr.hbm [resolvable:$true] %s26_s16 }
   0x4   :  { %20 = dma.hbm_to_vmem [thread:$0]  %s16_s11, 128, %s18_s13, [#allocation3]  }
   0x5   :  { %s150_s17 = smov [#allocation5]  }
   0x6   :  { %s28_s18 = sshll.u32 %s150_s17, 4  ;;  %s29_s18 = int_to_ptr.vmem [resolvable:$true] %s28_s18 }
   0x7   :  { %31 = dma.hbm_to_vmem [thread:$0]  %s27_s16, 16, %s29_s18, [#allocation6]  }
   0x8   :  { %143 = dma.done.wait [#allocation3], 128  }
   0x9   :  { %144 = vsyncadd [#allocation3], 4294967168 }
   0xa   :  { %145 = dma.done.wait [#allocation6], 16  }
   0xb   :  { %146 = vsyncadd [#allocation6], 4294967280  ;;  %v40_v0 = vld [vmem:[#allocation2] sm:$0xff]  ;;  %v70_v1 = vld [vmem:[#allocation5] ss:$0 sm:$0xff]  ;;  %s151_s0 = smov [#allocation7]  }
   0xc   :  { %v45_v2 = vmul.f32 %v70_v1, %v40_v0  ;;  %s54_s19 = sshll.u32 %s151_s0, 4  ;;  %s56_s22 = sshll.u32 %s178_s2, 4  ;;  %s55_s19 = int_to_ptr.vmem [resolvable:$true] %s54_s19  ;;  %s57_s22 = int_to_ptr.hbm [resolvable:$true] %s56_s22 }
   0xe   :  { %v46_v3 = vmul.f32 0.01, %v45_v2 }
  0x10   :  { %v47_v4 = vmax.f32 %v45_v2, %v46_v3 }
  0x12   :  { %48 = vst [vmem:[#allocation7] sm:$0xff] %v47_v4 }
  0x13   :  { %59 = dma.vmem_to_hbm [thread:$0]  %s55_s19, 128, %s57_s22, [#allocation4]  }
  0x14   :  { %147 = dma.done.wait [#allocation4], 128  }
  0x15   :  { %148 = vsyncadd [#allocation4], 4294967168 }
  0x16   :  { %64 = vsyncpa [#allocation3], 1 }
  0x17   :  { %65 = vsyncpa [#allocation6], 1 }
  0x18   :  { %66 = vsyncpa [#allocation4], 1 }

</bundles_post_ra>
